<compile_context>
chip_gen: v7x
topology: tpu7x:2x2x1
jax: 0.10.0
libtpu: 0.0.40
codegen_flags: <defaults>
</compile_context>

<pallas_src>
import math
import jax
import jax.numpy as jnp
from jax.experimental import pallas as pl
from jax.experimental.pallas import tpu as pltpu


def _classifier_kernel(x1_ref, x2_ref, w1a_ref, w1b_ref, b1_ref, w2_ref, b2_ref, o_ref):
    # hidden = relu([x1, x2] @ W1 + b1), computed without the concat.
    h = (jnp.dot(x1_ref[...], w1a_ref[...], preferred_element_type=jnp.float32)
         + jnp.dot(x2_ref[...], w1b_ref[...], preferred_element_type=jnp.float32)
         + b1_ref[...])
    h = jnp.maximum(h, 0.0)
    # second linear: (rows, dim) -> (rows, 1) via lane reduction (XLU), + bias
    y = jnp.sum(h * w2_ref[...], axis=-1, keepdims=True) + b2_ref[...]
    # exact sigmoid
    o_ref[...] = (1.0 / (1.0 + jnp.exp(-y))).astype(o_ref.dtype)


def _round_up(x, m):
    return ((x + m - 1) // m) * m


def classifier_pallas(x1, x2, w1, b1, w2, b2, *, max_block_rows=512):
    """Pallas forward of the PyTorch Classifier.

    x1, x2 : [..., dim] float32
    w1     : [2*dim, dim]   (input-major, i.e. y = x @ w1 + b1)
    b1     : [dim]
    w2     : [dim, 1]
    b2     : [1]
    returns: [...] float32 (squeezed last dim)
    """
    assert x1.shape == x2.shape
    dim = x1.shape[-1]
    lead_shape = x1.shape[:-1]

    x1f = x1.reshape(-1, dim)
    x2f = x2.reshape(-1, dim)
    n = x1f.shape[0]

    # Tile selection: one big block for small problems, 512-row blocks otherwise.
    n8 = _round_up(max(n, 1), 8)
    block_rows = n8 if n8 <= max_block_rows else max_block_rows
    n_pad = _round_up(n, block_rows)
    if n_pad != n:
        pad = n_pad - n
        x1f = jnp.pad(x1f, ((0, pad), (0, 0)))
        x2f = jnp.pad(x2f, ((0, pad), (0, 0)))

    # Split / reshape the parameters once, host/XLA side.
    w1a = w1[:dim, :]                      # (dim, dim)
    w1b = w1[dim:, :]                      # (dim, dim)
    b1_2d = b1.reshape(1, dim)             # (1, dim)
    w2_row = w2.reshape(1, dim)            # (1, dim)  -- second linear as a row
    b2_2d = b2.reshape(1, 1)               # (1, 1)

    grid = (n_pad // block_rows,)

    out = pl.pallas_call(
        _classifier_kernel,
        out_shape=jax.ShapeDtypeStruct((n_pad, 1), x1.dtype),
        grid_spec=pltpu.PrefetchScalarGridSpec(
            num_scalar_prefetch=0,
            grid=grid,
            in_specs=[
                pl.BlockSpec((block_rows, dim), lambda i: (i, 0)),   # x1
                pl.BlockSpec((block_rows, dim), lambda i: (i, 0)),   # x2
                pl.BlockSpec((dim, dim), lambda i: (0, 0)),          # W1a (resident)
                pl.BlockSpec((dim, dim), lambda i: (0, 0)),          # W1b (resident)
                pl.BlockSpec((1, dim), lambda i: (0, 0)),            # b1
                pl.BlockSpec((1, dim), lambda i: (0, 0)),            # w2 row
                pl.BlockSpec((1, 1), lambda i: (0, 0)),              # b2
            ],
            out_specs=pl.BlockSpec((block_rows, 1), lambda i: (i, 0)),
        ),
        compiler_params=pltpu.CompilerParams(
            dimension_semantics=("parallel",),
        ),
    )(x1f, x2f, w1a, w1b, b1_2d, w2_row, b2_2d)

    return out[:n, 0].reshape(lead_shape)


def classifier_ref(x1, x2, w1, b1, w2, b2):
    x = jnp.concatenate([x1, x2], axis=-1)
    h = jnp.maximum(x @ w1 + b1, 0.0)
    y = h @ w2 + b2
    return jax.nn.sigmoid(y)[..., 0]


if __name__ == "__main__":
    key = jax.random.PRNGKey(0)
    dim = 32
    batch = (2, 8)          # leading dims -> 16 rows after flatten

    k1, k2, k3, k4, k5, k6 = jax.random.split(key, 6)
    x1 = jax.random.normal(k1, batch + (dim,), dtype=jnp.float32)
    x2 = jax.random.normal(k2, batch + (dim,), dtype=jnp.float32)

    # Xavier-uniform style init, matching the PyTorch module's parameter shapes
    # (stored input-major so y = x @ W + b).
    lim1 = math.sqrt(6.0 / (2 * dim + dim))
    w1 = jax.random.uniform(k3, (2 * dim, dim), jnp.float32, -lim1, lim1)
    b1 = jax.random.uniform(k4, (dim,), jnp.float32, -0.1, 0.1)
    lim2 = math.sqrt(6.0 / (dim + 1))
    w2 = jax.random.uniform(k5, (dim, 1), jnp.float32, -lim2, lim2)
    b2 = jax.random.uniform(k6, (1,), jnp.float32, -0.1, 0.1)

    out = classifier_pallas(x1, x2, w1, b1, w2, b2)
    out = jax.block_until_ready(out)

    ref = classifier_ref(x1, x2, w1, b1, w2, b2)
    assert out.shape == ref.shape == batch, (out.shape, ref.shape)
    assert out.dtype == ref.dtype
    assert jnp.allclose(out, ref, atol=1e-5, rtol=1e-5), "mismatch vs reference"

    print("KERNEL_OK")
</pallas_src>

<mosaic_0001>
module attributes {stable_mosaic.version = 11 : i64} {
  func.func @_classifier_kernel(%arg0: i32, %arg1: memref<16x32xf32, #tpu.memory_space<vmem>>, %arg2: memref<16x32xf32, #tpu.memory_space<vmem>>, %arg3: memref<32x32xf32, #tpu.memory_space<vmem>>, %arg4: memref<32x32xf32, #tpu.memory_space<vmem>>, %arg5: memref<1x32xf32, #tpu.memory_space<vmem>>, %arg6: memref<1x32xf32, #tpu.memory_space<vmem>>, %arg7: memref<1x1xf32, #tpu.memory_space<vmem>>, %arg8: memref<16x1xf32, #tpu.memory_space<vmem>>) attributes {dimension_semantics = [#tpu.dimension_semantics<parallel>], iteration_bounds = array<i64: 1>, scalar_prefetch = 0 : i64, scratch_operands = 0 : i64, tpu.core_type = #tpu.core_type<tc>, window_params = [{transform_indices = @transform_0, window_bounds = array<i64: 16, 32>}, {transform_indices = @transform_1, window_bounds = array<i64: 16, 32>}, {pipeline_mode = #tpu.pipeline_mode<synchronous>, transform_indices = @transform_2, window_bounds = array<i64: 32, 32>}, {pipeline_mode = #tpu.pipeline_mode<synchronous>, transform_indices = @transform_3, window_bounds = array<i64: 32, 32>}, {pipeline_mode = #tpu.pipeline_mode<synchronous>, transform_indices = @transform_4, window_bounds = array<i64: 1, 32>}, {pipeline_mode = #tpu.pipeline_mode<synchronous>, transform_indices = @transform_5, window_bounds = array<i64: 1, 32>}, {pipeline_mode = #tpu.pipeline_mode<synchronous>, transform_indices = @transform_6, window_bounds = array<i64: 1, 1>}, {transform_indices = @transform_7, window_bounds = array<i64: 16, 1>}]} {
    %c0 = arith.constant 0 : index
    %c0_0 = arith.constant 0 : index
    %0 = vector.load %arg1[%c0, %c0_0] : memref<16x32xf32, #tpu.memory_space<vmem>>, vector<16x32xf32>
    %c0_1 = arith.constant 0 : index
    %c0_2 = arith.constant 0 : index
    %1 = vector.load %arg3[%c0_1, %c0_2] : memref<32x32xf32, #tpu.memory_space<vmem>>, vector<32x32xf32>
    %cst = arith.constant dense<0.000000e+00> : vector<16x32xf32>
    %2 = tpu.matmul %0, %1, %cst {dimension_numbers = #tpu.dot_dimension_numbers<[1], [0], [0], [1], [0, 0, 1, 1], [], []>} : vector<16x32xf32>, vector<32x32xf32>, vector<16x32xf32> -> vector<16x32xf32>
    %c0_3 = arith.constant 0 : index
    %c0_4 = arith.constant 0 : index
    %3 = vector.load %arg2[%c0_3, %c0_4] : memref<16x32xf32, #tpu.memory_space<vmem>>, vector<16x32xf32>
    %c0_5 = arith.constant 0 : index
    %c0_6 = arith.constant 0 : index
    %4 = vector.load %arg4[%c0_5, %c0_6] : memref<32x32xf32, #tpu.memory_space<vmem>>, vector<32x32xf32>
    %cst_7 = arith.constant dense<0.000000e+00> : vector<16x32xf32>
    %5 = tpu.matmul %3, %4, %cst_7 {dimension_numbers = #tpu.dot_dimension_numbers<[1], [0], [0], [1], [0, 0, 1, 1], [], []>} : vector<16x32xf32>, vector<32x32xf32>, vector<16x32xf32> -> vector<16x32xf32>
    %6 = arith.addf %2, %5 : vector<16x32xf32>
    %c0_8 = arith.constant 0 : index
    %c0_9 = arith.constant 0 : index
    %7 = vector.load %arg5[%c0_8, %c0_9] : memref<1x32xf32, #tpu.memory_space<vmem>>, vector<1x32xf32>
    %8 = vector.broadcast %7 : vector<1x32xf32> to vector<16x32xf32>
    %9 = arith.addf %6, %8 : vector<16x32xf32>
    %cst_10 = arith.constant 0.000000e+00 : f32
    %10 = vector.broadcast %cst_10 : f32 to vector<16x32xf32>
    %11 = arith.maximumf %9, %10 : vector<16x32xf32>
    %c0_11 = arith.constant 0 : index
    %c0_12 = arith.constant 0 : index
    %12 = vector.load %arg6[%c0_11, %c0_12] : memref<1x32xf32, #tpu.memory_space<vmem>>, vector<1x32xf32>
    %13 = vector.broadcast %12 : vector<1x32xf32> to vector<16x32xf32>
    %14 = arith.mulf %11, %13 : vector<16x32xf32>
    %cst_13 = arith.constant dense<0.000000e+00> : vector<16xf32>
    %15 = vector.multi_reduction <add>, %14, %cst_13 [1] : vector<16x32xf32> to vector<16xf32>
    %16 = vector.shape_cast %15 : vector<16xf32> to vector<16x1xf32>
    %c0_14 = arith.constant 0 : index
    %c0_15 = arith.constant 0 : index
    %17 = vector.load %arg7[%c0_14, %c0_15] : memref<1x1xf32, #tpu.memory_space<vmem>>, vector<1x1xf32>
    %18 = vector.broadcast %17 : vector<1x1xf32> to vector<16x1xf32>
    %19 = arith.addf %16, %18 : vector<16x1xf32>
    %cst_16 = arith.constant 0.000000e+00 : f32
    %20 = vector.broadcast %cst_16 : f32 to vector<16x1xf32>
    %21 = arith.subf %20, %19 : vector<16x1xf32>
    %22 = math.exp %21 : vector<16x1xf32>
    %cst_17 = arith.constant 1.000000e+00 : f32
    %23 = vector.broadcast %cst_17 : f32 to vector<16x1xf32>
    %24 = arith.addf %23, %22 : vector<16x1xf32>
    %cst_18 = arith.constant 1.000000e+00 : f32
    %25 = vector.broadcast %cst_18 : f32 to vector<16x1xf32>
    %26 = arith.divf %25, %24 : vector<16x1xf32>
    %c0_19 = arith.constant 0 : index
    %c0_20 = arith.constant 0 : index
    %27 = vector.load %arg8[%c0_19, %c0_20] : memref<16x1xf32, #tpu.memory_space<vmem>>, vector<16x1xf32>
    tpu.vector_store %arg8[%c0_19, %c0_20], %26 {strides = array<i32>} : memref<16x1xf32, #tpu.memory_space<vmem>>, vector<16x1xf32>,
    return
  }
  func.func @transform_0(%arg0: i32) -> (i32, i32) {
    %c0_i32 = arith.constant 0 : i32
    %c0_i32_0 = arith.constant 0 : i32
    return %arg0, %c0_i32 : i32, i32
  }
  func.func @transform_1(%arg0: i32) -> (i32, i32) {
    %c0_i32 = arith.constant 0 : i32
    %c0_i32_0 = arith.constant 0 : i32
    return %arg0, %c0_i32 : i32, i32
  }
  func.func @transform_2(%arg0: i32) -> (i32, i32) {
    %c0_i32 = arith.constant 0 : i32
    %c0_i32_0 = arith.constant 0 : i32
    %c0_i32_1 = arith.constant 0 : i32
    return %c0_i32, %c0_i32_0 : i32, i32
  }
  func.func @transform_3(%arg0: i32) -> (i32, i32) {
    %c0_i32 = arith.constant 0 : i32
    %c0_i32_0 = arith.constant 0 : i32
    %c0_i32_1 = arith.constant 0 : i32
    return %c0_i32, %c0_i32_0 : i32, i32
  }
  func.func @transform_4(%arg0: i32) -> (i32, i32) {
    %c0_i32 = arith.constant 0 : i32
    %c0_i32_0 = arith.constant 0 : i32
    %c0_i32_1 = arith.constant 0 : i32
    return %c0_i32, %c0_i32_0 : i32, i32
  }
  func.func @transform_5(%arg0: i32) -> (i32, i32) {
    %c0_i32 = arith.constant 0 : i32
    %c0_i32_0 = arith.constant 0 : i32
    %c0_i32_1 = arith.constant 0 : i32
    return %c0_i32, %c0_i32_0 : i32, i32
  }
  func.func @transform_6(%arg0: i32) -> (i32, i32) {
    %c0_i32 = arith.constant 0 : i32
    %c0_i32_0 = arith.constant 0 : i32
    %c0_i32_1 = arith.constant 0 : i32
    return %c0_i32, %c0_i32_0 : i32, i32
  }
  func.func @transform_7(%arg0: i32) -> (i32, i32) {
    %c0_i32 = arith.constant 0 : i32
    %c0_i32_0 = arith.constant 0 : i32
    return %arg0, %c0_i32 : i32, i32
  }
}

</mosaic_0001>

<bundles_post_ra>
// kernel: tpu_custom_call.1
= control target key start
LH: loop header
LB: loop body
LE: loop exit
PB: predicated region body
PF: predicated region fallthrough
CT: control target
= control target key end

     0   :  { %s623_s0 = inlined_call_operand.hbm [shape: f32[16,32], index: 0, kind: input, shape index: {}]   ;;  %s624_s1 = inlined_call_operand.hbm [shape: f32[16,32], index: 1, kind: input, shape index: {}]   ;;  %s625_s2 = inlined_call_operand.hbm [shape: f32[32,32], index: 2, kind: input, shape index: {}]   ;;  %s626_s3 = inlined_call_operand.hbm [shape: f32[32,32], index: 3, kind: input, shape index: {}]   ;;  %s627_s4 = inlined_call_operand.vmem [shape: f32[1,32], index: 4, kind: input, shape index: {}]   ;;  %s628_s5 = inlined_call_operand.vmem [shape: f32[1,32], index: 5, kind: input, shape index: {}]   ;;  %s629_s6 = inlined_call_operand.<no memory space> [shape: f32[1,1], index: 6, kind: input, shape index: {}]   ;;  %s630_s7 = inlined_call_operand.vmem [shape: f32[16,1], index: 7, kind: output, shape index: {}]  }
   0x1   :  { %v12_v0 = vstv %s629_s6 }
   0x2   :  { %13 = vst [vmem:[#allocation2] sm:$0x1] %v12_v0 }
   0x3   :  { %14 = vsyncpa [#allocation4], 0 }
   0x4   :  { %15 = vsyncpa [#allocation6], 0 }
   0x5   :  { %16 = vsyncpa [#allocation9], 0  ;;  %s482_s26 = smov [#allocation5]   ;;  %s483_s28 = smov [#allocation3]  }
   0x6   :  { %s34_s27 = sshll.u32 %s482_s26, 4  ;;  %s22_s29 = sshll.u32 %s483_s28, 4  ;;  %s35_s27 = int_to_ptr.vmem [resolvable:$true] %s34_s27  ;;  %s531_s29 = int_to_ptr.vmem [resolvable:$true] %s22_s29 }
   0x7   :  { %s388_s9 = scalar_lea.hbm %s624_s1, 256 }
   0x8   :  { %p389_p0 = scmp.ne.s32.totalorder %s624_s1, %s388_s9  ;;  %p392_p1 = scmp.lt.u32.totalorder %s388_s9, %s624_s1 }
   0xa   :  { %p394_p2 = pnand %p392_p1, %p389_p0 }
   0xc   :  { %397 = shalt.err (!%p394_p2)
}
   0xd   :  { %s398_s13 = scalar_lea.vmem %s35_s27, 256  ;;  %p403_p4 = scmp.lt.s32.totalorder %s35_s27, %s35_s27 }
   0xe   :  { %p399_p3 = scmp.ne.s32.totalorder %s35_s27, %s398_s13  ;;  %p404_p5 = scmp.lt.s32.totalorder %s398_s13, %s398_s13 }
  0x10   :  { %p405_p6 = por %p404_p5, %p403_p4 }
  0x12   :  { %p406_p7 = pnand %p405_p6, %p399_p3 }
  0x14   :  { %409 = shalt.err (!%p406_p7)
}
  0x15   :  { %s484_s14 = smov 128   ;;  %s485_s15 = smov 8  }
  0x16   :  { %40 = dma.hbm_to_vmem [thread:$0]  %s624_s1, 256, %s35_s27, [#allocation6], %s484_s14, %s484_s14, %s485_s15  }
  0x17   :  { %s410_s20 = scalar_lea.hbm %s623_s0, 256 }
  0x18   :  { %p411_p8 = scmp.ne.s32.totalorder %s623_s0, %s410_s20  ;;  %p414_p9 = scmp.lt.u32.totalorder %s410_s20, %s623_s0 }
  0x1a   :  { %p416_p10 = pnand %p414_p9, %p411_p8 }
  0x1c   :  { %419 = shalt.err (!%p416_p10)
}
  0x1d   :  { %s420_s25 = scalar_lea.vmem %s531_s29, 256  ;;  %p425_p12 = scmp.lt.s32.totalorder %s531_s29, %s531_s29 }
  0x1e   :  { %p421_p11 = scmp.ne.s32.totalorder %s531_s29, %s420_s25  ;;  %p426_p13 = scmp.lt.s32.totalorder %s420_s25, %s420_s25 }
  0x20   :  { %p427_p0 = por %p426_p13, %p425_p12 }
  0x22   :  { %p428_p1 = pnand %p427_p0, %p421_p11 }
  0x24   :  { %431 = shalt.err (!%p428_p1)
}
  0x25   :  { %28 = dma.hbm_to_vmem [thread:$0]  %s623_s0, 256, %s531_s29, [#allocation4], %s484_s14, %s484_s14, %s485_s15  }
  0x26   :  { %s486_s27 = smov [#allocation7]   ;;  %s487_s30 = smov [#allocation8]  }
  0x27   :  { %s46_s28 = sshll.u32 %s486_s27, 4  ;;  %s58_s8 = sshll.u32 %s487_s30, 4  ;;  %s47_s28 = int_to_ptr.vmem [resolvable:$true] %s46_s28  ;;  %s568_s8 = int_to_ptr.vmem [resolvable:$true] %s58_s8 }
  0x28   :  { %s432_s11 = scalar_lea.hbm %s625_s2, 512 }
  0x29   :  { %p433_p2 = scmp.ne.s32.totalorder %s625_s2, %s432_s11  ;;  %p436_p3 = scmp.lt.u32.totalorder %s432_s11, %s625_s2 }
  0x2b   :  { %p438_p4 = pnand %p436_p3, %p433_p2 }
  0x2d   :  { %441 = shalt.err (!%p438_p4)
}
  0x2e   :  { %s442_s0 = scalar_lea.vmem %s47_s28, 512  ;;  %p447_p6 = scmp.lt.s32.totalorder %s47_s28, %s47_s28 }
  0x2f   :  { %p443_p5 = scmp.ne.s32.totalorder %s47_s28, %s442_s0  ;;  %p448_p7 = scmp.lt.s32.totalorder %s442_s0, %s442_s0 }
  0x31   :  { %p449_p8 = por %p448_p7, %p447_p6 }
  0x33   :  { %p450_p9 = pnand %p449_p8, %p443_p5 }
  0x35   :  { %453 = shalt.err (!%p450_p9)
}
  0x36   :  { %52 = dma.hbm_to_vmem [thread:$0]  %s625_s2, 512, %s47_s28, [#allocation6], %s484_s14, %s484_s14, %s485_s15  }
  0x37   :  { %s454_s20 = scalar_lea.hbm %s626_s3, 512 }
  0x38   :  { %p455_p10 = scmp.ne.s32.totalorder %s626_s3, %s454_s20  ;;  %p458_p11 = scmp.lt.u32.totalorder %s454_s20, %s626_s3 }
  0x3a   :  { %p460_p12 = pnand %p458_p11, %p455_p10 }
  0x3c   :  { %463 = shalt.err (!%p460_p12)
}
  0x3d   :  { %s464_s25 = scalar_lea.vmem %s568_s8, 512  ;;  %p469_p0 = scmp.lt.s32.totalorder %s568_s8, %s568_s8 }
  0x3e   :  { %p465_p13 = scmp.ne.s32.totalorder %s568_s8, %s464_s25  ;;  %p470_p1 = scmp.lt.s32.totalorder %s464_s25, %s464_s25 }
  0x40   :  { %p471_p2 = por %p470_p1, %p469_p0 }
  0x42   :  { %p472_p3 = pnand %p471_p2, %p465_p13 }
  0x44   :  { %475 = shalt.err (!%p472_p3)
}
  0x45   :  { %64 = dma.hbm_to_vmem [thread:$0]  %s626_s3, 512, %s568_s8, [#allocation9], %s484_s14, %s484_s14, %s485_s15  }
  0x46   :  { %476 = dma.done.wait [#allocation4], 256  }
  0x47   :  { %477 = vsyncadd [#allocation4], 4294967040 }
  0x48   :  { %478 = dma.done.wait [#allocation6], 768  }
  0x49   :  { %479 = vsyncadd [#allocation6], 4294966528 }
  0x4a   :  { %480 = dma.done.wait [#allocation9], 512  }
  0x4b   :  { %481 = vsyncadd [#allocation9], 4294966784  ;;  %v91_v1 = vld [vmem:[#allocation8] sm:$0xff]  ;;  %v92_v2 = vld [vmem:[#allocation8 + $0x8] sm:$0xff]  ;;  %vm95_vm0 = vcmask 261120   ;;  %vm305_vm1 = vcmask 7168  }
  0x4c   :  { %v85_v3 = vld [vmem:[#allocation7] sm:$0xff]  ;;  %v356_v4 = vpack.c.bf16 %v92_v2, %v91_v1  ;;  %v86_v5 = vld [vmem:[#allocation7 + $0x8] sm:$0xff]  ;;  %v93_v6 = vld [vmem:[#allocation8 + $0x10] sm:$0xff] }
  0x4d   :  { %v94_v7 = vld [vmem:[#allocation8 + $0x18] sm:$0xff]  ;;  %v364_v8 = vpack.c.bf16 %v86_v5, %v85_v3  ;;  %v87_v10 = vld [vmem:[#allocation7 + $0x10] sm:$0xff]  ;;  %v83_v14 = vld [vmem:[#allocation3] sm:$0xff] }
  0x4e   :  { %v360_v9 = vpack.c.bf16 %v94_v7, %v93_v6  ;;  %v88_v11 = vld [vmem:[#allocation7 + $0x18] sm:$0xff]  ;;  %v89_v12 = vld [vmem:[#allocation5] sm:$0xff]  ;;  %357 = vmatprep.subr.bf16.mxu1 %v356_v4  ;;  %353 = vmatprep.mubr.msk.f32.mxu0 %vm95_vm0, %v83_v14  ;;  %v84_v16 = vld [vmem:[#allocation3 + $0x8] sm:$0xff] }
  0x4f   :  { %v368_v13 = vpack.c.bf16 %v88_v11, %v87_v10  ;;  %342 = vmatprep.mubr.msk.f32.mxu1 %vm95_vm0, %v89_v12  ;;  %365 = vmatprep.subr.bf16.mxu0 %v364_v8  ;;  %v90_v15 = vld [vmem:[#allocation5 + $0x8] sm:$0xff] }
  0x50   :  { %359 = vmatpush3.bf16.msra.mxu1 %v356_v4  ;;  %367 = vmatpush3.bf16.msra.mxu0 %v364_v8  ;;  %v319_v19 = vld [vmem:[%s627_s4] ss:$0 sm:$0xff] }
  0x51   :  { %361 = vmatprep.subr.bf16.mxu1 %v360_v9  ;;  %369 = vmatprep.subr.bf16.mxu0 %v368_v13  ;;  %v320_v26 = vld [vmem:[%s628_s5] ss:$0 sm:$0xff] }
  0x52   :  { %v321_v33 = vld [vmem:[#allocation2] ss:$0 sm:$0xff] }
  0x54   :  { %363 = vmatpush3.bf16.msra.mxu1 %v360_v9  ;;  %371 = vmatpush3.bf16.msra.mxu0 %v368_v13 }
  0x57   :  { %343 = vmatmul.mubr.msk.f32.vlgmr.msra.gmra.mrb[0].mxu1 %vm95_vm0, %v90_v15  ;;  %354 = vmatmul.mubr.msk.f32.vlgmr.msra.gmra.mrb[0].mxu0 %vm95_vm0, %v84_v16 }
 0x12a   :  { %v344_v17 = vpop.f32.mrb[0].mxu1  ;;  %v355_v18 = vpop.f32.mrb[0].mxu0 }
 0x12b   :  { %v168_v20 = vpop.f32.mrb[1].mxu1  ;;  %v255_v21 = vadd.f32 %v355_v18, %v344_v17  ;;  %v249_v22 = vpop.f32.mrb[1].mxu0 }
 0x12c   :  { %v250_v23 = vadd.f32 %v249_v22, %v168_v20 }
 0x12d   :  { %v266_v24 = vadd.f32 %v319_v19, %v255_v21 }
 0x12e   :  { %v265_v25 = vadd.f32 %v319_v19, %v250_v23 }
 0x12f   :  { %v268_v27 = vmax.f32 %v266_v24, 0.0 }
 0x130   :  { %v267_v28 = vmax.f32 %v265_v25, 0.0 }
 0x131   :  { %v277_v31 = vmul.f32 %v320_v26, %v268_v27 }
 0x132   :  { %v276_v29 = vmul.f32 %v320_v26, %v267_v28 }
 0x133   :  { %v281_v32 = vsel %vm95_vm0, %v277_v31, 0.0 }
 0x134   :  { %v278_v30 = vsel %vm95_vm0, %v276_v29, 0.0 }
 0x135   :  { %279 = vadd.xlane.f32.xlu0 %v278_v30 }
 0x139   :  { %282 = vadd.xlane.f32.xlu0 %v281_v32 }
 0x1c2   :  { %v280_v34 = vpop.xlane.xlu0 %279 }
 0x1c3   :  { %v291_v35 = vadd.f32 %v321_v33, %v280_v34 }
 0x1c5   :  { %v293_v36 = vsub.f32 0.0, %v291_v35 }
 0x1c6   :  { %v283_v37 = vpop.xlane.xlu0 %282 }
 0x1c7   :  { %v295_v38 = vmul.f32 1.442695, %v293_v36  ;;  %v292_v39 = vadd.f32 %v321_v33, %v283_v37 }
 0x1c9   :  { %380 = vpow2.f32 %v295_v38  ;;  %v294_v40 = vsub.f32 0.0, %v292_v39 }
 0x1cb   :  { %v297_v41 = vmul.f32 1.442695, %v294_v40 }
 0x1cd   :  { %382 = vpow2.f32 %v297_v41 }
 0x1d3   :  { %v381_v42 = vpop.eup %380 }
 0x1d4   :  { %v299_v43 = vadd.f32 1.0, %v381_v42 }
 0x1d6   :  { %384 = vrcp.f32 %v299_v43 }
 0x1d7   :  { %v383_v44 = vpop.eup %382 }
 0x1d8   :  { %v300_v45 = vadd.f32 1.0, %v383_v44 }
 0x1da   :  { %386 = vrcp.f32 %v300_v45 }
 0x1e0   :  { %v385_v46 = vpop.eup %384 }
 0x1e1   :  { %306 = vst.msk [vmem:[%s630_s7] sm:$0xff] %vm305_vm1, %v385_v46 }
 0x1e4   :  { %v387_v47 = vpop.eup %386 }
 0x1e5   :  { %307 = vst.msk [vmem:[%s630_s7 + $0x8] sm:$0xff] %vm305_vm1, %v387_v47 }
 0x1e6   :  { %312 = vsyncpa [#allocation4], 1 }
 0x1e7   :  { %313 = vsyncpa [#allocation6], 1 }
 0x1e8   :  { %314 = vsyncpa [#allocation9], 1 }

</bundles_post_ra>
